<compile_context>
chip_gen: v6e
topology: v6e:2x2x1
jax: 0.10.0
libtpu: 0.0.40
codegen_flags: <defaults>
</compile_context>

<pallas_src>
import functools

import jax
import jax.numpy as jnp
from jax.experimental import pallas as pl
from jax.experimental.pallas import tpu as pltpu

GAMMA_POS = 0.0   # specialised in-kernel: weight == 1 on the target column
GAMMA_NEG = 4.0   # specialised in-kernel: weight == p**4 off the target column
EPS = 0.1


def _asl_kernel(x_ref, tgt_ref, loss_ref, *, lane_dense_out):
    x = x_ref[...].astype(jnp.float32)          # (tb, C) logits (bf16 input OK)
    tgt = tgt_ref[...]                          # (tb, 1) int32 class ids
    tb, C = x.shape

    # Numerically-stable log-softmax.  exp(z) is reused for the LSE and the probs;
    # the denominator is inverted once per ROW (pl.reciprocal on (tb,1)) instead of
    # a per-element divide, so the EUP port mostly carries the (tb,C) exp.
    m = jnp.max(x, axis=-1, keepdims=True)
    z = x - m
    ez = jnp.exp(z)
    se = jnp.sum(ez, axis=-1, keepdims=True)    # (tb, 1)
    inv_se = pl.reciprocal(se, approx=False)    # approx=True OK if tolerance allows
    logp = z - jnp.log(se)                      # (tb, C) log-probabilities
    p = ez * inv_se                             # (tb, C) softmax probabilities

    # One-hot kept as a bool mask - no float targets / anti_targets intermediates.
    is_tgt = jax.lax.broadcasted_iota(jnp.int32, (tb, C), 1) == tgt

    # Asymmetric focusing weight, specialised for gamma_pos=0 / gamma_neg=4:
    #   target column:     (1 - p_t)^0       = 1
    #   non-target column: (1 - (1 - p_c))^4 = p_c^4
    p2 = p * p
    w_neg = p2 * p2

    # Label smoothing folded into per-column scalar coefficients; select fused
    # BEFORE the multiply; negation folded into the scale.
    coeff_pos = (1.0 - EPS) + EPS / C
    coeff_neg = EPS / C
    neg_scale = jnp.where(is_tgt, -coeff_pos, (-coeff_neg) * w_neg)
    contrib = neg_scale * logp                  # (tb, C), already negated

    if lane_dense_out:
        # Reduce the class axis on the (otherwise idle) MXU: ones(8,C) contracted
        # with contrib over C lands the per-row losses directly on the LANE axis,
        # giving an unmasked lane-dense writeback (no (tb,1) masked single-lane
        # stores and no XLU relayout of the row sums).
        ones = jnp.ones((8, C), dtype=jnp.float32)
        sums = jax.lax.dot_general(
            ones, contrib,
            dimension_numbers=(((1,), (1,)), ((), ())),
            preferred_element_type=jnp.float32)     # (8, tb), rows identical
        loss_ref[...] = sums[0:1, :]                # (1, tb)
    else:
        # Huge-C fallback (tb < 128 with several batch blocks): column output.
        loss_ref[...] = jnp.sum(contrib, axis=-1, keepdims=True)   # (tb, 1)


def _choose_block_rows(batch, num_classes, itemsize):
    """Batch-tile rows targeting ~1 MiB of logits per tile.

    Big enough to amortise the ~0.35us grid-step overhead and approach the HBM
    roofline, small enough that double-buffered input tiles plus the f32 (tb, C)
    temporaries stay inside every generation's scoped VMEM (v5e 16 MiB default,
    v6e 32 MiB, v7x 32 MiB default / 64 MiB physical).
    """
    target_tile_bytes = 1 << 20
    tb = max(8, target_tile_bytes // (num_classes * itemsize))
    tb = min(tb, 2048)
    b_ceil = -(-batch // 8) * 8
    if tb >= b_ceil:
        return b_ceil                    # single block covers the whole batch
    if tb >= 128:
        return (tb // 128) * 128         # lane-dense output + packed-dtype friendly
    return max(8, (tb // 8) * 8)


def asl_single_label_loss(inputs, target, *, block_rows=None, reduction="mean",
                          cast_inputs_to_bf16=False):
    """inputs: (B, C) float logits; target: (B,) int class ids.
    Mirrors ASLSingleLabel(gamma_pos=0, gamma_neg=4, eps=0.1) forward."""
    B, C = inputs.shape
    if cast_inputs_to_bf16 and inputs.dtype == jnp.float32:
        # Optional: halves HBM read bytes on this HBM-bound kernel; the kernel
        # upcasts to f32 internally so the LSE math is unchanged.
        inputs = inputs.astype(jnp.bfloat16)

    itemsize = jnp.dtype(inputs.dtype).itemsize
    tb = block_rows if block_rows is not None else _choose_block_rows(B, C, itemsize)
    b_ceil = -(-B // 8) * 8
    tb = max(8, min(int(tb), b_ceil))
    tb = (tb // 128) * 128 if tb >= 128 else -(-tb // 8) * 8
    num_blocks = pl.cdiv(B, tb)

    tgt2d = target.astype(jnp.int32).reshape(B, 1)

    # Lane-dense (1, tb) output blocks whenever they satisfy the (8,128)/full-dim
    # tiling rule; otherwise fall back to the (tb, 1) column layout (huge-C case).
    lane_dense = (tb % 128 == 0) or (num_blocks == 1)
    padded_rows = num_blocks * tb          # >= B; the logits are NOT padded - the
                                           # ragged last input block is masked.
    if lane_dense:
        out_shape = jax.ShapeDtypeStruct((1, padded_rows), jnp.float32)
        out_spec = pl.BlockSpec((1, tb), lambda i: (0, i))
    else:
        out_shape = jax.ShapeDtypeStruct((padded_rows, 1), jnp.float32)
        out_spec = pl.BlockSpec((tb, 1), lambda i: (i, 0))

    per_sample = pl.pallas_call(
        functools.partial(_asl_kernel, lane_dense_out=lane_dense),
        out_shape=out_shape,
        grid=(num_blocks,),
        in_specs=[
            pl.BlockSpec((tb, C), lambda i: (i, 0)),
            pl.BlockSpec((tb, 1), lambda i: (i, 0)),
        ],
        out_specs=out_spec,
        compiler_params=pltpu.CompilerParams(
            dimension_semantics=("parallel",),
            vmem_limit_bytes=32 * 1024 * 1024,
        ),
    )(inputs, tgt2d)

    per_sample = per_sample.reshape(-1)[:B]   # drop ragged-tail rows before reducing
    if reduction == "mean":
        return jnp.mean(per_sample)
    if reduction == "sum":
        return jnp.sum(per_sample)
    return per_sample

# TODO(synk): pl.pallas_call is not differentiable by default - wrap with
#   jax.custom_vjp (pure-JAX backward; the asymmetric weight participates in the
#   gradient, as in the PyTorch module) before using this loss for training.
# TODO(synk): for num_classes so large that even an (8, C) tile + f32 temporaries
#   exceed VMEM, add an in-kernel class-chunked two-pass loop (row-max / sum-exp
#   pass, then contribution pass) so the logits are still read from HBM once.
# TODO(synk): for C << 128 lane utilisation is C/128; packing several rows into one
#   lane-row would need segmented softmax reductions and is not implemented.


def _asl_reference(inputs, target):
    """Pure-JAX reference mirroring the PyTorch forward."""
    B, C = inputs.shape
    log_preds = jax.nn.log_softmax(inputs.astype(jnp.float32), axis=-1)
    targets = jax.nn.one_hot(target, C, dtype=jnp.float32)
    anti_targets = 1.0 - targets
    xs_pos = jnp.exp(log_preds)
    xs_neg = 1.0 - xs_pos
    xs_pos = xs_pos * targets
    xs_neg = xs_neg * anti_targets
    w = jnp.power(1.0 - xs_pos - xs_neg, GAMMA_POS * targets + GAMMA_NEG * anti_targets)
    log_preds = log_preds * w
    tc = targets * (1.0 - EPS) + EPS / C
    loss = -(tc * log_preds)
    return jnp.mean(jnp.sum(loss, axis=-1))


if __name__ == "__main__":
    key = jax.random.PRNGKey(0)
    k1, k2 = jax.random.split(key)

    # Small shapes consistent with the module: (batch, num_classes) logits.
    B, C = 8, 32
    inputs = jax.random.normal(k1, (B, C), dtype=jnp.float32)
    target = jax.random.randint(k2, (B,), 0, C, dtype=jnp.int32)

    loss = asl_single_label_loss(inputs, target)
    jax.block_until_ready(loss)
    ref = _asl_reference(inputs, target)
    assert jnp.allclose(loss, ref, atol=1e-5, rtol=1e-5), (loss, ref)

    # Multi-block, ragged batch (300 % 128 != 0), lane-dense-output path (no pad).
    B2, C2 = 300, 32
    k3, k4 = jax.random.split(k1)
    inputs2 = jax.random.normal(k3, (B2, C2), dtype=jnp.float32)
    target2 = jax.random.randint(k4, (B2,), 0, C2, dtype=jnp.int32)
    loss2 = asl_single_label_loss(inputs2, target2, block_rows=128)
    jax.block_until_ready(loss2)
    ref2 = _asl_reference(inputs2, target2)
    assert jnp.allclose(loss2, ref2, atol=1e-5, rtol=1e-5), (loss2, ref2)

    # Column-output fallback path (tb < 128 with multiple blocks, as used for huge C).
    loss3 = asl_single_label_loss(inputs2, target2, block_rows=64)
    jax.block_until_ready(loss3)
    assert jnp.allclose(loss3, ref2, atol=1e-5, rtol=1e-5), (loss3, ref2)

    print("KERNEL_OK")
</pallas_src>

<mosaic_0001>
module attributes {stable_mosaic.version = 11 : i64} {
  func.func @_asl_kernel(%arg0: i32, %arg1: memref<8x32xf32, #tpu.memory_space<vmem>>, %arg2: memref<8x1xi32, #tpu.memory_space<vmem>>, %arg3: memref<1x8xf32, #tpu.memory_space<vmem>>) attributes {dimension_semantics = [#tpu.dimension_semantics<parallel>], iteration_bounds = array<i64: 1>, scalar_prefetch = 0 : i64, scratch_operands = 0 : i64, tpu.core_type = #tpu.core_type<tc>, window_params = [{transform_indices = @transform_0, window_bounds = array<i64: 8, 32>}, {transform_indices = @transform_1, window_bounds = array<i64: 8, 1>}, {transform_indices = @transform_2, window_bounds = array<i64: 1, 8>}]} {
    %c0 = arith.constant 0 : index
    %c0_0 = arith.constant 0 : index
    %0 = vector.load %arg1[%c0, %c0_0] : memref<8x32xf32, #tpu.memory_space<vmem>>, vector<8x32xf32>
    %c0_1 = arith.constant 0 : index
    %c0_2 = arith.constant 0 : index
    %1 = vector.load %arg2[%c0_1, %c0_2] : memref<8x1xi32, #tpu.memory_space<vmem>>, vector<8x1xi32>
    %cst = arith.constant dense<0xFF800000> : vector<8xf32>
    %2 = vector.multi_reduction <maximumf>, %0, %cst [1] : vector<8x32xf32> to vector<8xf32>
    %3 = vector.shape_cast %2 : vector<8xf32> to vector<8x1xf32>
    %4 = vector.broadcast %3 : vector<8x1xf32> to vector<8x32xf32>
    %5 = arith.subf %0, %4 : vector<8x32xf32>
    %6 = math.exp %5 : vector<8x32xf32>
    %cst_3 = arith.constant dense<0.000000e+00> : vector<8xf32>
    %7 = vector.multi_reduction <add>, %6, %cst_3 [1] : vector<8x32xf32> to vector<8xf32>
    %8 = vector.shape_cast %7 : vector<8xf32> to vector<8x1xf32>
    %9 = tpu.reciprocal %8 : vector<8x1xf32> -> vector<8x1xf32>
    %10 = math.log %8 : vector<8x1xf32>
    %11 = vector.broadcast %10 : vector<8x1xf32> to vector<8x32xf32>
    %12 = arith.subf %5, %11 : vector<8x32xf32>
    %13 = vector.broadcast %9 : vector<8x1xf32> to vector<8x32xf32>
    %14 = arith.mulf %6, %13 : vector<8x32xf32>
    %15 = tpu.iota {dimensions = array<i32: 1>} : vector<8x32xi32>
    %16 = vector.broadcast %1 : vector<8x1xi32> to vector<8x32xi32>
    %17 = arith.cmpi eq, %15, %16 : vector<8x32xi32>
    %18 = arith.mulf %14, %14 : vector<8x32xf32>
    %19 = arith.mulf %18, %18 : vector<8x32xf32>
    %cst_4 = arith.constant -3.125000e-03 : f32
    %20 = vector.broadcast %cst_4 : f32 to vector<8x32xf32>
    %21 = arith.mulf %20, %19 : vector<8x32xf32>
    %cst_5 = arith.constant -0.903124988 : f32
    %22 = vector.broadcast %cst_5 : f32 to vector<8x32xf32>
    %23 = arith.select %17, %22, %21 : vector<8x32xi1>, vector<8x32xf32>
    %24 = arith.mulf %23, %12 : vector<8x32xf32>
    %cst_6 = arith.constant 1.000000e+00 : f32
    %25 = vector.broadcast %cst_6 : f32 to vector<8x32xf32>
    %cst_7 = arith.constant dense<0.000000e+00> : vector<8x8xf32>
    %26 = tpu.matmul %25, %24, %cst_7 {dimension_numbers = #tpu.dot_dimension_numbers<[1], [1], [0], [0], [0, 0, 1, 0], [], []>} : vector<8x32xf32>, vector<8x32xf32>, vector<8x8xf32> -> vector<8x8xf32>
    %27 = vector.extract_strided_slice %26 {offsets = [0, 0], sizes = [1, 8], strides = [1, 1]} : vector<8x8xf32> to vector<1x8xf32>
    %c0_8 = arith.constant 0 : index
    %c0_9 = arith.constant 0 : index
    %28 = vector.load %arg3[%c0_8, %c0_9] : memref<1x8xf32, #tpu.memory_space<vmem>>, vector<1x8xf32>
    tpu.vector_store %arg3[%c0_8, %c0_9], %27 {strides = array<i32>} : memref<1x8xf32, #tpu.memory_space<vmem>>, vector<1x8xf32>,
    return
  }
  func.func @transform_0(%arg0: i32) -> (i32, i32) {
    %c0_i32 = arith.constant 0 : i32
    %c0_i32_0 = arith.constant 0 : i32
    return %arg0, %c0_i32 : i32, i32
  }
  func.func @transform_1(%arg0: i32) -> (i32, i32) {
    %c0_i32 = arith.constant 0 : i32
    %c0_i32_0 = arith.constant 0 : i32
    return %arg0, %c0_i32 : i32, i32
  }
  func.func @transform_2(%arg0: i32) -> (i32, i32) {
    %c0_i32 = arith.constant 0 : i32
    %c0_i32_0 = arith.constant 0 : i32
    return %c0_i32, %arg0 : i32, i32
  }
}

</mosaic_0001>

<bundles_post_ra>
// kernel: tpu_custom_call.1
= control target key start
LH: loop header
LB: loop body
LE: loop exit
PB: predicated region body
PF: predicated region fallthrough
CT: control target
= control target key end

     0   :  { %vm14_vm0 = vcmask 261120   ;;  %s209_s0 = inlined_call_operand.vmem [shape: f32[8,32], index: 0, kind: input, shape index: {}]   ;;  %s210_s1 = inlined_call_operand.vmem [shape: s32[8,1], index: 1, kind: input, shape index: {}]   ;;  %s211_s2 = inlined_call_operand.hbm [shape: f32[1,8], index: 2, kind: output, shape index: {}]  }
   0x1   :  { %v12_v0 = vld [vmem:[%s209_s0] sm:$0xff] }
   0x2   :  { %7 = vsyncpa [#allocation3], 0  ;;  %v15_v1 = vsel %vm14_vm0, %v12_v0, -inf  ;;  %v13_v2 = vld [vmem:[%s210_s1] sm:$0xff]  ;;  %v176_v3 = vmov 0   ;;  %v177_v9 = vmov 0.0   ;;  %v29_v11 = vlaneseq }
   0x3   :  { %16 = vmax.xlane.f32.xlu0 %v15_v1  ;;  %146 = vset.pattern.permute.xlu1 %v176_v3  ;;  %vm178_vm1 = vmmov 0   ;;  %v179_v24 = vmov 1.0   ;;  %s180_s0 = smov [#allocation2]   ;;  %vm116_vm3 = vcmask 57344  }
   0x4   :  { %147 = vset.pattern.permute.xlu0 %v176_v3  ;;  %32 = vperm.xlu1 %146, %v13_v2   ;;  %v30_v15 = vand.u32 127, %v29_v11  ;;  %s124_s1 = sshll.u32 %s180_s0, 4  ;;  %s125_s1 = int_to_ptr.vmem [resolvable:$true] %s124_s1 }
   0x5   :  { %136 = vmatprep.subr.mxu0 %v177_v9  ;;  %138 = vmatprep.mubr.msk.f32.mxu0 %vm178_vm1, %v177_v9  ;;  %s154_s13 = scalar_lea.vmem %s125_s1, 16  ;;  %s158_s14 = scalar_lea.vmem %s125_s1, 32 }
   0x6   :  { %p155_p0 = scmp.ne.s32.totalorder %s125_s1, %s154_s13  ;;  %p159_p1 = scmp.lt.s32.totalorder %s125_s1, %s125_s1 }
   0x7   :  { %p160_p2 = scmp.lt.s32.totalorder %s158_s14, %s154_s13 }
   0x9   :  { %p161_p3 = por %p160_p2, %p159_p1 }
   0xb   :  { %p162_p4 = pnand %p161_p3, %p155_p0 }
  0x7f   :  { %v33_v16 = vpop.permute.xlu1 %32 }
  0x80   :  { %vm34_vm2 = vcmp.eq.s32.totalorder %v30_v15, %v33_v16 }
  0x8c   :  { %v17_v4 = vpop.xlane.xlu0 %16 }
  0x8d   :  { %v18_v5 = vsub.f32 %v12_v0, %v17_v4 }
  0x8f   :  { %v19_v6 = vmul.f32 1.442695, %v18_v5 }
  0x91   :  { %148 = vpow2.f32 %v19_v6 }
  0x9e   :  { %v149_v7 = vpop.eup %148 }
  0x9f   :  { %v21_v8 = vsel %vm14_vm0, %v149_v7, 0.0 }
  0xa0   :  { %22 = vadd.xlane.f32.xlu0 %v21_v8 }
 0x129   :  { %v23_v10 = vpop.xlane.xlu0 %22 }
 0x12a   :  { %150 = vrcp.f32 %v23_v10 }
 0x12b   :  { %152 = vlog2.f32 %v23_v10 }
 0x137   :  { %v151_v12 = vpop.eup %150 }
 0x138   :  { %v153_v13 = vpop.eup %152  ;;  %v28_v14 = vmul.f32 %v151_v12, %v149_v7 }
 0x139   :  { %v26_v18 = vmul.f32 0.6931472, %v153_v13 }
 0x13a   :  { %v35_v17 = vmul.f32 %v28_v14, %v28_v14 }
 0x13b   :  { %v27_v21 = vsub.f32 %v18_v5, %v26_v18 }
 0x13c   :  { %v36_v19 = vmul.f32 %v35_v17, %v35_v17 }
 0x13e   :  { %v37_v20 = vmul.f32 -0.003125, %v36_v19 }
 0x140   :  { %v38_v22 = vsel %vm34_vm2, -0.903125, %v37_v20 }
 0x141   :  { %v39_v23 = vmul.f32 %v38_v22, %v27_v21 }
 0x143   :  { %137 = vmatpush3.xpose.msk.msra.mxu0 %vm14_vm0, %v39_v23 }
 0x146   :  { %139 = vmatmul.mubr.msk.f32.vlgmr.msra.gmra.mxu0 %vm14_vm0, %v179_v24 }
 0x206   :  { %v112_v25 = vpop.f32.mrf.mxu0 }
 0x207   :  { %117 = vst.msk [vmem:[#allocation2] sm:$0x1] %vm116_vm3, %v112_v25 }
 0x208   :  { %v140_v26 = vpop.f32.mrf.mxu0 }
 0x209   :  { %165 = shalt.err (!%p162_p4)
}
 0x20a   :  { %127 = dma.vmem_to_hbm [thread:$0]  %s125_s1, 16, %s211_s2, [#allocation3]  }
 0x20b   :  { %174 = dma.done.wait [#allocation3], 16  }
 0x20c   :  { %175 = vsyncadd [#allocation3], 4294967280 }
 0x20d   :  { %131 = vsyncpa [#allocation3], 1 }

</bundles_post_ra>
